<compile_context>
chip_gen: v7x
topology: tpu7x:2x2x1
jax: 0.10.0
libtpu: 0.0.40
codegen_flags: <defaults>
</compile_context>

<pallas_src>
from functools import partial

import jax
import jax.numpy as jnp
from jax.experimental import pallas as pl
from jax.experimental.pallas import tpu as pltpu

# ---------------- small, TPU-friendly model config ----------------
DIM = 128          # args.dim
N_LAYERS = 2       # args.n_layers
N_HEADS = 4        # args.n_heads
VOCAB = 512        # args.vocab_size
NORM_EPS = 1e-5    # args.norm_eps
# TODO(synk): the reference skeleton's RMSNorm.__init__ hardcodes eps=1 and has
# no forward/weight; the real LLaMA RMSNorm uses args.norm_eps + a gain, which
# is what we implement here (gain folded into the output weight).
MAX_SEQ_LEN = 16   # args.max_seq_len (small)
BATCH = 2
SEQ = 1            # forward asserts seq_len == 1
M_PAD = 8          # pad B*S rows up to a full 8-sublane vreg


def precompute_theta_pos_frequencies(head_dim: int, seq_len: int, theta: float = 10000.0):
    # TODO(synk): the reference skeleton computes `freqs` but returns nothing and
    # the rotary embedding is never applied (EncoderBlock has no forward); the
    # same frequencies are computed here only for structural fidelity.
    assert head_dim % 2 == 0, "Dimension must be divisible by 2"
    theta_pos = jnp.arange(0, head_dim, 2, dtype=jnp.float32)
    inv_theta = 1.0 / (theta ** (theta_pos / head_dim))
    m = jnp.arange(seq_len, dtype=jnp.float32)
    return jnp.outer(m, inv_theta)  # (seq_len, head_dim // 2)


# ---------------- fused Pallas kernel: gather + RMSNorm + output projection ----------------
def fused_forward_kernel(tok_ref, emb_hbm, wo_hbm, out_ref,
                         h_ref, wo_vmem, sem_g, sem_w, *, bs_real, eps):
    # tok_ref:  (BS,) int32 in SMEM (scalar prefetch)
    # emb_hbm:  (VOCAB, DIM) f32, left in HBM (memory_space=pl.ANY)
    # wo_hbm:   (DIM, VOCAB) bf16 gain-folded, transposed output weight (HBM)
    # out_ref:  (M_PAD, VOCAB) f32
    # h_ref:    (M_PAD, DIM) f32 VMEM scratch for gathered activations
    # wo_vmem:  (DIM, VOCAB) bf16 VMEM scratch for the weight slab
    # sem_g:    (BS,) DMA semaphores for the row gathers
    # sem_w:    ()   DMA semaphore for the weight copy
    m_pad, dim = h_ref.shape

    # 1) Kick off the (largest) weight HBM->VMEM copy first so the gather
    #    round-trip and the RMSNorm math hide underneath it.
    w_cp = pltpu.make_async_copy(wo_hbm, wo_vmem, sem_w)
    w_cp.start()

    # 2) Zero the whole activation tile with one unmasked full-vreg store.
    #    The gather DMAs below overwrite rows 0..bs_real-1 afterwards.
    h_ref[...] = jnp.zeros_like(h_ref)

    # 3) Embedding gather fused into the kernel: one row-DMA per real token,
    #    driven by the SMEM-prefetched token ids.
    copies = []
    for i in range(bs_real):
        tok = tok_ref[i]
        cp = pltpu.make_async_copy(
            emb_hbm.at[pl.ds(tok, 1), :],   # (1, DIM) row of the HBM table
            h_ref.at[pl.ds(i, 1), :],       # (1, DIM) row of the VMEM scratch
            sem_g.at[i])
        cp.start()
        copies.append(cp)
    for cp in copies:
        cp.wait()

    # 4) RMSNorm: reduction / rsqrt in f32 (gain is pre-folded into the weight).
    h = h_ref[...]
    mean_sq = jnp.mean(h * h, axis=-1, keepdims=True)            # (M_PAD, 1)
    h_norm = h * jax.lax.rsqrt(mean_sq + eps)                     # (M_PAD, DIM) f32

    # 5) Output projection: wait for the weight slab, then bf16 operands on the
    #    MXU with f32 accumulation, one lane-dense (M_PAD, VOCAB) store.
    w_cp.wait()
    out_ref[...] = jnp.dot(h_norm.astype(jnp.bfloat16), wo_vmem[...],
                           preferred_element_type=jnp.float32)


def fused_forward(tokens_flat, tok_embeddings, w_out_t_bf16):
    bs_real = tokens_flat.shape[0]
    dim, vocab = w_out_t_bf16.shape
    m_pad = max(M_PAD, ((bs_real + 7) // 8) * 8)

    # Advisory cost hint for XLA's scheduler around this tiny latency-bound call.
    cost = pl.CostEstimate(
        flops=2 * m_pad * dim * vocab,
        transcendentals=0,
        bytes_accessed=(dim * vocab * 2            # bf16 weight slab
                        + bs_real * dim * 4        # gathered embedding rows
                        + m_pad * vocab * 4        # f32 logits out
                        + bs_real * 4),            # token ids
    )

    return pl.pallas_call(
        partial(fused_forward_kernel, bs_real=bs_real, eps=NORM_EPS),
        out_shape=jax.ShapeDtypeStruct((m_pad, vocab), jnp.float32),
        grid_spec=pltpu.PrefetchScalarGridSpec(
            num_scalar_prefetch=1,                # tokens -> SMEM
            grid=(1,),                            # whole problem in one step
            in_specs=[
                pl.BlockSpec(memory_space=pl.ANY),    # emb table stays in HBM
                pl.BlockSpec(memory_space=pl.ANY),    # W_out^T stays in HBM; manual DMA
            ],
            out_specs=pl.BlockSpec((m_pad, vocab), lambda i, tok: (0, 0)),
            scratch_shapes=[
                pltpu.VMEM((m_pad, dim), jnp.float32),     # gathered activations
                pltpu.VMEM((dim, vocab), jnp.bfloat16),    # weight slab
                pltpu.SemaphoreType.DMA((bs_real,)),       # per-row gather semaphores
                pltpu.SemaphoreType.DMA(()),               # weight-copy semaphore
            ],
        ),
        # TODO(synk): at real vocab sizes (e.g. 32K) reintroduce a vocab grid axis
        # marked "parallel" (2 TCs on v7x) with TILE_V kept a large multiple of
        # 128 and double-buffered weight tiles sized against scoped VMEM
        # (16 MiB v5e / 32 MiB v6e-v7x defaults; v7x physical is only 64 MiB —
        # plan ~half the v6e TILE_V or set vmem_limit_bytes).  Also switch the
        # weight to int8 (v5e/v6e) or fp8 e4m3 (v7x, no int MXU path) with a
        # post-accumulation scale to halve the dominant HBM stream.  At
        # VOCAB=512 a single step with bf16 weights is strictly faster.
        # TODO(synk): at larger batch, replace the per-row 512 B gather DMAs with
        # a pipelined pl.Element(1) gather over a rows grid axis.
        compiler_params=pltpu.CompilerParams(
            dimension_semantics=("arbitrary",)),
        cost_estimate=cost,
    )(tokens_flat, tok_embeddings, w_out_t_bf16)


# ---------------- full forward (thin wrapper around one pallas_call) ----------------
def transformer_forward(tokens, start_pos, params):
    B, S = tokens.shape
    assert S == 1, "Only one token at a time can be processed"
    tokens_flat = tokens.reshape(-1).astype(jnp.int32)              # (B*S,)
    # Clamp so a bad token id can never drive an out-of-range DMA.
    tokens_flat = jnp.clip(tokens_flat, 0, VOCAB - 1)

    # Rotary frequencies for the current position (unused: layers are identity).
    _freqs = params["freqs_complex"][start_pos:start_pos + S]

    # TODO(synk): EncoderBlock has an empty __init__ and no forward in the
    # reference skeleton — the N_LAYERS layers are identity here.

    logits_padded = fused_forward(tokens_flat,
                                  params["tok_embeddings"],
                                  params["w_out_t_bf16"])           # (M_PAD, VOCAB)
    logits = logits_padded[:B * S]                                  # drop padding rows
    return logits.reshape(B, S, VOCAB).astype(jnp.float32)


# ---------------- pure-JAX reference for validation ----------------
def reference_forward(tokens, start_pos, params):
    B, S = tokens.shape
    h = jnp.take(params["tok_embeddings"], tokens.reshape(-1), axis=0)   # (B*S, DIM) f32
    mean_sq = jnp.mean(h * h, axis=-1, keepdims=True)
    h_norm = h * jax.lax.rsqrt(mean_sq + NORM_EPS)
    # Same precision recipe as the kernel: bf16 operands (gain already folded
    # into the weight), f32 accumulation.
    logits = jnp.dot(h_norm.astype(jnp.bfloat16), params["w_out_t_bf16"],
                     preferred_element_type=jnp.float32)
    return logits.reshape(B, S, VOCAB).astype(jnp.float32)


if __name__ == "__main__":
    key = jax.random.PRNGKey(0)
    k_emb, k_out, k_tok = jax.random.split(key, 3)

    # nn.Linear(dim, vocab, bias=False) weight is (vocab, dim); pre-transpose,
    # fold the RMSNorm gain (diag(g) @ W^T), cast to bf16.
    w_out = (0.02 * jax.random.normal(k_out, (VOCAB, DIM))).astype(jnp.float32)
    norm_weight = jnp.ones((DIM,), jnp.float32)     # RMSNorm gain (ones init)
    w_out_t_folded = (norm_weight[:, None] * w_out.T).astype(jnp.bfloat16)

    params = {
        # nn.Embedding(vocab_size, dim)
        "tok_embeddings": (0.02 * jax.random.normal(k_emb, (VOCAB, DIM))).astype(jnp.float32),
        # gain-folded, pre-transposed output projection weight
        "w_out_t_bf16": w_out_t_folded,
        # precomputed rotary frequencies for max_seq_len positions
        "freqs_complex": precompute_theta_pos_frequencies(DIM // N_HEADS, MAX_SEQ_LEN),
    }

    tokens = jax.random.randint(k_tok, (BATCH, SEQ), 0, VOCAB, dtype=jnp.int32)
    start_pos = 3

    out = transformer_forward(tokens, start_pos, params)
    out = jax.block_until_ready(out)

    ref = reference_forward(tokens, start_pos, params)
    assert out.shape == (BATCH, SEQ, VOCAB) and out.dtype == jnp.float32
    assert jnp.allclose(out, ref, atol=1e-3, rtol=1e-3), "mismatch vs reference"

    print("KERNEL_OK")
</pallas_src>

<mosaic_0001>
module attributes {stable_mosaic.version = 11 : i64} {
  func.func @fused_forward_kernel(%arg0: i32, %arg1: memref<2xi32, #tpu.memory_space<smem>>, %arg2: memref<512x128xf32, #tpu.memory_space<any>>, %arg3: memref<128x512xbf16, #tpu.memory_space<any>>, %arg4: memref<8x512xf32, #tpu.memory_space<vmem>>, %arg5: memref<8x128xf32, #tpu.memory_space<vmem>>, %arg6: memref<128x512xbf16, #tpu.memory_space<vmem>>, %arg7: memref<2x!tpu.dma_semaphore, #tpu.memory_space<semaphore_mem>>, %arg8: memref<!tpu.dma_semaphore, #tpu.memory_space<semaphore_mem>>) attributes {dimension_semantics = [#tpu.dimension_semantics<arbitrary>], iteration_bounds = array<i64: 1>, scalar_prefetch = 1 : i64, scratch_operands = 4 : i64, tpu.core_type = #tpu.core_type<tc>, window_params = [{}, {}, {pipeline_mode = #tpu.pipeline_mode<synchronous>, transform_indices = @transform_2, window_bounds = array<i64: 8, 512>}]} {
    tpu.enqueue_dma source(%arg3 : memref<128x512xbf16, #tpu.memory_space<any>>) target(%arg6 : memref<128x512xbf16, #tpu.memory_space<vmem>>) target_semaphore(%arg8 : memref<!tpu.dma_semaphore, #tpu.memory_space<semaphore_mem>>)
    %cst = arith.constant 0.000000e+00 : f32
    %0 = vector.broadcast %cst : f32 to vector<8x128xf32>
    %c0 = arith.constant 0 : index
    %c0_0 = arith.constant 0 : index
    %1 = vector.load %arg5[%c0, %c0_0] : memref<8x128xf32, #tpu.memory_space<vmem>>, vector<8x128xf32>
    tpu.vector_store %arg5[%c0, %c0_0], %0 {strides = array<i32>} : memref<8x128xf32, #tpu.memory_space<vmem>>, vector<8x128xf32>,
    %c0_1 = arith.constant 0 : index
    %2 = memref.load %arg1[%c0_1] : memref<2xi32, #tpu.memory_space<smem>>
    %c0_i32 = arith.constant 0 : i32
    %c0_i32_2 = arith.constant 0 : i32
    %3 = tpu.memref_slice %arg2[%2, %c0_i32_2] : memref<512x128xf32, #tpu.memory_space<any>> -> memref<1x128xf32, #tpu.memory_space<any>>
    %c0_i32_3 = arith.constant 0 : i32
    %c0_i32_4 = arith.constant 0 : i32
    %4 = tpu.memref_slice %arg5[%c0_i32_3, %c0_i32_4] : memref<8x128xf32, #tpu.memory_space<vmem>> -> memref<1x128xf32, #tpu.memory_space<vmem>>
    %5 = tpu.memref_slice %arg7[%c0_i32] : memref<2x!tpu.dma_semaphore, #tpu.memory_space<semaphore_mem>> -> memref<1x!tpu.dma_semaphore, #tpu.memory_space<semaphore_mem>>
    %6 = tpu.memref_squeeze %5 : memref<1x!tpu.dma_semaphore, #tpu.memory_space<semaphore_mem>> -> memref<!tpu.dma_semaphore, #tpu.memory_space<semaphore_mem>>
    tpu.enqueue_dma source(%3 : memref<1x128xf32, #tpu.memory_space<any>>) target(%4 : memref<1x128xf32, #tpu.memory_space<vmem>>) target_semaphore(%6 : memref<!tpu.dma_semaphore, #tpu.memory_space<semaphore_mem>>)
    %c1 = arith.constant 1 : index
    %7 = memref.load %arg1[%c1] : memref<2xi32, #tpu.memory_space<smem>>
    %c1_i32 = arith.constant 1 : i32
    %c0_i32_5 = arith.constant 0 : i32
    %8 = tpu.memref_slice %arg2[%7, %c0_i32_5] : memref<512x128xf32, #tpu.memory_space<any>> -> memref<1x128xf32, #tpu.memory_space<any>>
    %c1_i32_6 = arith.constant 1 : i32
    %c0_i32_7 = arith.constant 0 : i32
    %9 = tpu.memref_slice %arg5[%c1_i32_6, %c0_i32_7] : memref<8x128xf32, #tpu.memory_space<vmem>> -> memref<1x128xf32, #tpu.memory_space<vmem>>
    %10 = tpu.memref_slice %arg7[%c1_i32] : memref<2x!tpu.dma_semaphore, #tpu.memory_space<semaphore_mem>> -> memref<1x!tpu.dma_semaphore, #tpu.memory_space<semaphore_mem>>
    %11 = tpu.memref_squeeze %10 : memref<1x!tpu.dma_semaphore, #tpu.memory_space<semaphore_mem>> -> memref<!tpu.dma_semaphore, #tpu.memory_space<semaphore_mem>>
    tpu.enqueue_dma source(%8 : memref<1x128xf32, #tpu.memory_space<any>>) target(%9 : memref<1x128xf32, #tpu.memory_space<vmem>>) target_semaphore(%11 : memref<!tpu.dma_semaphore, #tpu.memory_space<semaphore_mem>>)
    %c0_i32_8 = arith.constant 0 : i32
    %c0_i32_9 = arith.constant 0 : i32
    %12 = tpu.memref_slice %arg2[%2, %c0_i32_9] : memref<512x128xf32, #tpu.memory_space<any>> -> memref<1x128xf32, #tpu.memory_space<any>>
    %c0_i32_10 = arith.constant 0 : i32
    %c0_i32_11 = arith.constant 0 : i32
    %13 = tpu.memref_slice %arg5[%c0_i32_10, %c0_i32_11] : memref<8x128xf32, #tpu.memory_space<vmem>> -> memref<1x128xf32, #tpu.memory_space<vmem>>
    %14 = tpu.memref_slice %arg7[%c0_i32_8] : memref<2x!tpu.dma_semaphore, #tpu.memory_space<semaphore_mem>> -> memref<1x!tpu.dma_semaphore, #tpu.memory_space<semaphore_mem>>
    %15 = tpu.memref_squeeze %14 : memref<1x!tpu.dma_semaphore, #tpu.memory_space<semaphore_mem>> -> memref<!tpu.dma_semaphore, #tpu.memory_space<semaphore_mem>>
    tpu.wait_dma2 semaphore(%15 : memref<!tpu.dma_semaphore, #tpu.memory_space<semaphore_mem>>) src(%12 : memref<1x128xf32, #tpu.memory_space<any>>) dst(%13 : memref<1x128xf32, #tpu.memory_space<vmem>>)
    %c1_i32_12 = arith.constant 1 : i32
    %c0_i32_13 = arith.constant 0 : i32
    %16 = tpu.memref_slice %arg2[%7, %c0_i32_13] : memref<512x128xf32, #tpu.memory_space<any>> -> memref<1x128xf32, #tpu.memory_space<any>>
    %c1_i32_14 = arith.constant 1 : i32
    %c0_i32_15 = arith.constant 0 : i32
    %17 = tpu.memref_slice %arg5[%c1_i32_14, %c0_i32_15] : memref<8x128xf32, #tpu.memory_space<vmem>> -> memref<1x128xf32, #tpu.memory_space<vmem>>
    %18 = tpu.memref_slice %arg7[%c1_i32_12] : memref<2x!tpu.dma_semaphore, #tpu.memory_space<semaphore_mem>> -> memref<1x!tpu.dma_semaphore, #tpu.memory_space<semaphore_mem>>
    %19 = tpu.memref_squeeze %18 : memref<1x!tpu.dma_semaphore, #tpu.memory_space<semaphore_mem>> -> memref<!tpu.dma_semaphore, #tpu.memory_space<semaphore_mem>>
    tpu.wait_dma2 semaphore(%19 : memref<!tpu.dma_semaphore, #tpu.memory_space<semaphore_mem>>) src(%16 : memref<1x128xf32, #tpu.memory_space<any>>) dst(%17 : memref<1x128xf32, #tpu.memory_space<vmem>>)
    %c0_16 = arith.constant 0 : index
    %c0_17 = arith.constant 0 : index
    %20 = vector.load %arg5[%c0_16, %c0_17] : memref<8x128xf32, #tpu.memory_space<vmem>>, vector<8x128xf32>
    %21 = arith.mulf %20, %20 : vector<8x128xf32>
    %cst_18 = arith.constant dense<0.000000e+00> : vector<8xf32>
    %22 = vector.multi_reduction <add>, %21, %cst_18 [1] : vector<8x128xf32> to vector<8xf32>
    %23 = vector.shape_cast %22 : vector<8xf32> to vector<8x1xf32>
    %cst_19 = arith.constant 1.280000e+02 : f32
    %24 = vector.broadcast %cst_19 : f32 to vector<8x1xf32>
    %25 = arith.divf %23, %24 : vector<8x1xf32>
    %cst_20 = arith.constant 9.99999974E-6 : f32
    %26 = vector.broadcast %cst_20 : f32 to vector<8x1xf32>
    %27 = arith.addf %25, %26 : vector<8x1xf32>
    %28 = math.rsqrt %27 : vector<8x1xf32>
    %29 = vector.broadcast %28 : vector<8x1xf32> to vector<8x128xf32>
    %30 = arith.mulf %20, %29 : vector<8x128xf32>
    tpu.wait_dma2 semaphore(%arg8 : memref<!tpu.dma_semaphore, #tpu.memory_space<semaphore_mem>>) src(%arg3 : memref<128x512xbf16, #tpu.memory_space<any>>) dst(%arg6 : memref<128x512xbf16, #tpu.memory_space<vmem>>)
    %31 = arith.truncf %30 : vector<8x128xf32> to vector<8x128xbf16>
    %c0_21 = arith.constant 0 : index
    %c0_22 = arith.constant 0 : index
    %32 = vector.load %arg6[%c0_21, %c0_22] : memref<128x512xbf16, #tpu.memory_space<vmem>>, vector<128x512xbf16>
    %cst_23 = arith.constant dense<0.000000e+00> : vector<8x512xf32>
    %33 = tpu.matmul %31, %32, %cst_23 {dimension_numbers = #tpu.dot_dimension_numbers<[1], [0], [0], [1], [0, 0, 1, 1], [], []>} : vector<8x128xbf16>, vector<128x512xbf16>, vector<8x512xf32> -> vector<8x512xf32>
    %c0_24 = arith.constant 0 : index
    %c0_25 = arith.constant 0 : index
    %34 = vector.load %arg4[%c0_24, %c0_25] : memref<8x512xf32, #tpu.memory_space<vmem>>, vector<8x512xf32>
    tpu.vector_store %arg4[%c0_24, %c0_25], %33 {strides = array<i32>} : memref<8x512xf32, #tpu.memory_space<vmem>>, vector<8x512xf32>,
    return
  }
  func.func @transform_2(%arg0: i32, %arg1: memref<2xi32, #tpu.memory_space<smem>>) -> (i32, i32) {
    %c0_i32 = arith.constant 0 : i32
    %c0_i32_0 = arith.constant 0 : i32
    %c0_i32_1 = arith.constant 0 : i32
    return %c0_i32, %c0_i32_0 : i32, i32
  }
}

</mosaic_0001>

<bundles_post_ra>
// kernel: tpu_custom_call.1
= control target key start
LH: loop header
LB: loop body
LE: loop exit
PB: predicated region body
PF: predicated region fallthrough
CT: control target
= control target key end

     0   :  { %s468_s0 = inlined_call_operand.hbm [shape: s32[2], index: 0, kind: input, shape index: {}]   ;;  %s469_s1 = inlined_call_operand.hbm [shape: f32[512,128], index: 1, kind: input, shape index: {}]   ;;  %s470_s2 = inlined_call_operand.hbm [shape: bf16[128,512], index: 2, kind: input, shape index: {}]   ;;  %s471_s3 = inlined_call_operand.hbm [shape: f32[8,512], index: 3, kind: output, shape index: {}]  }
   0x1   :  { %s279_s14 = scalar_lea.hbm %s468_s0, 16 }
   0x2   :  { %p280_p0 = scmp.ne.s32.totalorder %s468_s0, %s279_s14  ;;  %p283_p1 = scmp.lt.u32.totalorder %s279_s14, %s468_s0 }
   0x4   :  { %p285_p2 = pnand %p283_p1, %p280_p0 }
   0x6   :  { %288 = shalt.err (!%p285_p2)  }
   0x7   :  { %s369_s19 = smov [#allocation7]  }
   0x8   :  { %9 = dma.hbm_to_smem %s468_s0, 16, %s369_s19, [#allocation6] }
   0x9   :  { %359 = dma.done.wait [#allocation6], 16 }
   0xa   :  { %360 = vsyncadd [#allocation6], 4294967280 }
   0xb   :  { %11 = sfence }
   0xc   :  { %12 = vsyncpa [#allocation9], 0  ;;  %s18_s22 = sld [smem:[#allocation0]]   ;;  %s370_s23 = smov [#allocation3]   ;;  %v379_v0 = vmov 0.0  }
   0xd   :  { %s26_s24 = sshll.u32 %s370_s23, 4  ;;  %s371_s25 = smov 512   ;;  %s27_s24 = int_to_ptr.vmem [resolvable:$true] %s26_s24 }
   0xe   :  { %30 = sst [smem:[#allocation11]] %s371_s25  ;;  %s372_s26 = smov 4  }
   0xf   :  { %32 = sst [smem:[#allocation11 + $0x1]] %s371_s25  ;;  %s373_s27 = smov 64  }
  0x10   :  { %34 = sst [smem:[#allocation11 + $0x2]] %s372_s26  ;;  %s374_s29 = smov 128  }
  0x11   :  { %36 = sst [smem:[#allocation11 + $0x3]] %s373_s27  ;;  %s375_s0 = smov 2  }
  0x12   :  { %s254_s28 = sshll.u32 %s18_s22, 26  ;;  %38 = sst [smem:[#allocation11 + $0x4]] %s374_s29 }
  0x13   :  { %s255_s30 = sadd.s32 134217728, %s254_s28  ;;  %40 = sst [smem:[#allocation11 + $0x5]] %s375_s0 }
  0x14   :  { %s376_s4 = smov 256   ;;  %44 = sst [smem:[#allocation11 + $0x7]] %s373_s27 }
  0x15   :  { %42 = sst [smem:[#allocation11 + $0x6]] %s376_s4  ;;  %s377_s5 = smov [#allocation5]  }
  0x16   :  { %46 = sst [smem:[#allocation11 + $0x8]] %s372_s26  ;;  %s378_s6 = smov [#allocation10]  }
  0x17   :  { %48 = dma.general %s470_s2, 4096, %s27_s24, %s377_s5, %s378_s6, [#allocation11], %s255_s30, 0  }
  0x18   :  { %49 = vst [vmem:[#allocation2] sm:$0xff] %v379_v0  ;;  %s50_s9 = sld [smem:[#allocation7]]  ;;  %s419_s10 = sld [smem:[#allocation7 + $0x1]] }
  0x19   :  { %s380_s11 = smov [#allocation2]   ;;  %s381_s13 = smov [#allocation2 + $0x1]  }
  0x1a   :  { %s60_s12 = sshll.u32 %s380_s11, 4  ;;  %s76_s14 = sshll.u32 %s381_s13, 4  ;;  %s421_s12 = int_to_ptr.vmem [resolvable:$true] %s60_s12  ;;  %s423_s14 = int_to_ptr.vmem [resolvable:$true] %s76_s14 }
  0x1b   :  { %s291_s22 = scalar_lea.hbm %s469_s1, 8192 }
  0x1e   :  { %s256_s15 = sshll.u32 %s50_s9, 4  ;;  %s258_s2 = sshll.u32 %s419_s10, 4 }
  0x1f   :  { %s52_s18 = scalar_lea.hbm %s469_s1, %s256_s15 }
  0x20   :  { %s289_s19 = scalar_lea.hbm %s52_s18, 16  ;;  %p292_p4 = scmp.lt.u32.totalorder %s52_s18, %s469_s1 }
  0x21   :  { %p290_p3 = scmp.ne.s32.totalorder %s52_s18, %s289_s19  ;;  %p293_p5 = scmp.lt.u32.totalorder %s291_s22, %s289_s19 }
  0x22   :  { %p295_p7 = scmp.lt.u32.totalorder %s289_s19, %s52_s18 }
  0x23   :  { %p294_p6 = por %p293_p5, %p292_p4 }
  0x25   :  { %p296_p8 = por %p295_p7, %p294_p6 }
  0x27   :  { %p297_p9 = pnand %p296_p8, %p290_p3 }
  0x29   :  { %300 = shalt.err (!%p297_p9)  }
  0x2a   :  { %s301_s25 = scalar_lea.vmem %s421_s12, 16  ;;  %s305_s26 = scalar_lea.vmem %s421_s12, 128 }
  0x2b   :  { %p302_p10 = scmp.ne.s32.totalorder %s421_s12, %s301_s25  ;;  %p306_p11 = scmp.lt.s32.totalorder %s421_s12, %s421_s12 }
  0x2c   :  { %p307_p12 = scmp.lt.s32.totalorder %s305_s26, %s301_s25 }
  0x2e   :  { %p308_p13 = por %p307_p12, %p306_p11 }
  0x30   :  { %p309_p0 = pnand %p308_p13, %p302_p10 }
  0x32   :  { %312 = shalt.err (!%p309_p0)  }
  0x33   :  { %63 = dma.hbm_to_vmem [thread:$0]  %s52_s18, 16, %s421_s12, [#allocation4] }
  0x34   :  { %s66_s29 = scalar_lea.hbm %s469_s1, %s258_s2 }
  0x35   :  { %s313_s30 = scalar_lea.hbm %s66_s29, 16  ;;  %p316_p2 = scmp.lt.u32.totalorder %s66_s29, %s469_s1 }
  0x36   :  { %p314_p1 = scmp.ne.s32.totalorder %s66_s29, %s313_s30  ;;  %p317_p3 = scmp.lt.u32.totalorder %s291_s22, %s313_s30 }
  0x37   :  { %p319_p5 = scmp.lt.u32.totalorder %s313_s30, %s66_s29 }
  0x38   :  { %p318_p4 = por %p317_p3, %p316_p2 }
  0x3a   :  { %p320_p6 = por %p319_p5, %p318_p4 }
  0x3c   :  { %p321_p7 = pnand %p320_p6, %p314_p1 }
  0x3e   :  { %324 = shalt.err (!%p321_p7)  }
  0x3f   :  { %s325_s5 = scalar_lea.vmem %s423_s14, 16  ;;  %p330_p9 = scmp.lt.s32.totalorder %s423_s14, %s421_s12 }
  0x40   :  { %p326_p8 = scmp.ne.s32.totalorder %s423_s14, %s325_s5  ;;  %p331_p10 = scmp.lt.s32.totalorder %s305_s26, %s325_s5 }
  0x42   :  { %p332_p11 = por %p331_p10, %p330_p9 }
  0x44   :  { %p333_p12 = pnand %p332_p11, %p326_p8 }
  0x46   :  { %336 = shalt.err (!%p333_p12)  }
  0x47   :  { %79 = dma.hbm_to_vmem [thread:$0]  %s66_s29, 16, %s423_s14, [#allocation4 + $0x1] }
  0x48   :  { %361 = dma.done.wait [#allocation4], 16 }
  0x49   :  { %362 = vsyncadd [#allocation4], 4294967280 }
  0x4a   :  { %363 = dma.done.wait [#allocation4 + $0x1], 16 }
  0x4b   :  { %364 = vsyncadd [#allocation4 + $0x1], 4294967280  ;;  %v85_v1 = vld [vmem:[#allocation2] sm:$0xff] }
  0x4c   :  { %v86_v2 = vmul.f32 %v85_v1, %v85_v1 }
  0x4e   :  { %87 = vadd.xlane.f32.xlu0 %v86_v2 }
  0xdb   :  { %v88_v3 = vpop.xlane.xlu0 %87 }
  0xdc   :  { %v90_v4 = vmul.f32 0.0078125, %v88_v3 }
  0xde   :  { %v91_v5 = vadd.f32 1e-05, %v90_v4 }
  0xe0   :  { %277 = vrsqrt.f32 %v91_v5 }
  0xea   :  { %v278_v6 = vpop.eup %277 }
  0xeb   :  { %v452_v7 = vmul.f32 %v278_v6, %v85_v1 }
  0xec   :  { %365 = dma.done.wait [#allocation5], 4096 }
  0xed   :  { %366 = vsyncadd [#allocation5], 4294963200  ;;  %v382_v8 = vmov 0   ;;  %v100_v9 = vld [vmem:[#allocation3 + $0x8] sm:$0xff]  ;;  %v102_v10 = vld [vmem:[#allocation3 + $0x18] sm:$0xff]  ;;  %v98_v41 = vpack.c.bf16 %v452_v7, %v452_v7  ;;  %s383_s1 = smov [#allocation8]  }
  0xee   :  { %163 = vmatprep.mubr.bf16.mxu0 %v382_v8  ;;  %204 = vmatprep.mubr.bf16.mxu1 %v382_v8  ;;  %v99_v11 = vld [vmem:[#allocation3] sm:$0xff]  ;;  %v101_v12 = vld [vmem:[#allocation3 + $0x10] sm:$0xff]  ;;  %v104_v13 = vld [vmem:[#allocation3 + $0x28] sm:$0xff]  ;;  %s223_s6 = sshll.u32 %s383_s1, 4  ;;  %s224_s6 = int_to_ptr.vmem [resolvable:$true] %s223_s6 }
  0xef   :  { %131 = vmatprep.subr.bf16.mxu0 %v100_v9  ;;  %172 = vmatprep.subr.bf16.mxu1 %v102_v10  ;;  %v106_v14 = vld [vmem:[#allocation3 + $0x38] sm:$0xff]  ;;  %v103_v15 = vld [vmem:[#allocation3 + $0x20] sm:$0xff]  ;;  %v105_v16 = vld [vmem:[#allocation3 + $0x30] sm:$0xff]  ;;  %s337_s7 = scalar_lea.vmem %s224_s6, 512  ;;  %p342_p0 = scmp.lt.s32.totalorder %s224_s6, %s224_s6 }
  0xf0   :  { %132 = vmatpush1.bf16.msra.mxu0 %v99_v11  ;;  %173 = vmatpush1.bf16.msra.mxu1 %v101_v12  ;;  %v108_v17 = vld [vmem:[#allocation3 + $0x48] sm:$0xff]  ;;  %v110_v18 = vld [vmem:[#allocation3 + $0x58] sm:$0xff]  ;;  %v107_v19 = vld [vmem:[#allocation3 + $0x40] sm:$0xff]  ;;  %p338_p13 = scmp.ne.s32.totalorder %s224_s6, %s337_s7  ;;  %p343_p1 = scmp.lt.s32.totalorder %s337_s7, %s337_s7 }
  0xf1   :  { %133 = vmatprep.subr.bf16.mxu0 %v104_v13  ;;  %174 = vmatprep.subr.bf16.mxu1 %v106_v14  ;;  %v109_v20 = vld [vmem:[#allocation3 + $0x50] sm:$0xff]  ;;  %v112_v21 = vld [vmem:[#allocation3 + $0x68] sm:$0xff]  ;;  %v114_v22 = vld [vmem:[#allocation3 + $0x78] sm:$0xff] }
  0xf2   :  { %v111_v23 = vld [vmem:[#allocation3 + $0x60] sm:$0xff]  ;;  %v113_v24 = vld [vmem:[#allocation3 + $0x70] sm:$0xff]  ;;  %v116_v25 = vld [vmem:[#allocation3 + $0x88] sm:$0xff]  ;;  %p344_p2 = por %p343_p1, %p342_p0 }
  0xf3   :  { %v118_v26 = vld [vmem:[#allocation3 + $0x98] sm:$0xff]  ;;  %v115_v27 = vld [vmem:[#allocation3 + $0x80] sm:$0xff]  ;;  %v117_v28 = vld [vmem:[#allocation3 + $0x90] sm:$0xff] }
  0xf4   :  { %134 = vmatpush1.bf16.msra.mxu0 %v103_v15  ;;  %175 = vmatpush1.bf16.msra.mxu1 %v105_v16  ;;  %v120_v29 = vld [vmem:[#allocation3 + $0xa8] sm:$0xff]  ;;  %v122_v30 = vld [vmem:[#allocation3 + $0xb8] sm:$0xff]  ;;  %v119_v31 = vld [vmem:[#allocation3 + $0xa0] sm:$0xff]  ;;  %p345_p3 = pnand %p344_p2, %p338_p13 }
  0xf5   :  { %135 = vmatprep.subr.bf16.mxu0 %v108_v17  ;;  %176 = vmatprep.subr.bf16.mxu1 %v110_v18  ;;  %v121_v32 = vld [vmem:[#allocation3 + $0xb0] sm:$0xff]  ;;  %v124_v33 = vld [vmem:[#allocation3 + $0xc8] sm:$0xff]  ;;  %v126_v34 = vld [vmem:[#allocation3 + $0xd8] sm:$0xff] }
  0xf6   :  { %v123_v35 = vld [vmem:[#allocation3 + $0xc0] sm:$0xff]  ;;  %v125_v36 = vld [vmem:[#allocation3 + $0xd0] sm:$0xff]  ;;  %v128_v37 = vld [vmem:[#allocation3 + $0xe8] sm:$0xff] }
  0xf7   :  { %v130_v38 = vld [vmem:[#allocation3 + $0xf8] sm:$0xff]  ;;  %v127_v39 = vld [vmem:[#allocation3 + $0xe0] sm:$0xff]  ;;  %v129_v40 = vld [vmem:[#allocation3 + $0xf0] sm:$0xff] }
  0xf8   :  { %136 = vmatpush1.bf16.msra.mxu0 %v107_v19  ;;  %177 = vmatpush1.bf16.msra.mxu1 %v109_v20 }
  0xf9   :  { %137 = vmatprep.subr.bf16.mxu0 %v112_v21  ;;  %178 = vmatprep.subr.bf16.mxu1 %v114_v22 }
  0xfc   :  { %138 = vmatpush1.bf16.msra.mxu0 %v111_v23  ;;  %179 = vmatpush1.bf16.msra.mxu1 %v113_v24 }
  0xfd   :  { %139 = vmatprep.subr.bf16.mxu0 %v116_v25  ;;  %180 = vmatprep.subr.bf16.mxu1 %v118_v26 }
 0x100   :  { %140 = vmatpush1.bf16.msra.mxu0 %v115_v27  ;;  %181 = vmatpush1.bf16.msra.mxu1 %v117_v28 }
 0x101   :  { %141 = vmatprep.subr.bf16.mxu0 %v120_v29  ;;  %182 = vmatprep.subr.bf16.mxu1 %v122_v30 }
 0x104   :  { %142 = vmatpush1.bf16.msra.mxu0 %v119_v31  ;;  %183 = vmatpush1.bf16.msra.mxu1 %v121_v32 }
 0x105   :  { %143 = vmatprep.subr.bf16.mxu0 %v124_v33  ;;  %184 = vmatprep.subr.bf16.mxu1 %v126_v34 }
 0x108   :  { %144 = vmatpush1.bf16.msra.mxu0 %v123_v35  ;;  %185 = vmatpush1.bf16.msra.mxu1 %v125_v36 }
 0x109   :  { %145 = vmatprep.subr.bf16.mxu0 %v128_v37  ;;  %186 = vmatprep.subr.bf16.mxu1 %v130_v38 }
 0x10c   :  { %146 = vmatpush1.bf16.msra.mxu0 %v127_v39  ;;  %187 = vmatpush1.bf16.msra.mxu1 %v129_v40 }
 0x10f   :  { %164 = vmatmul.mubr.bf16.vlgmr.msra.gmra.mrb[0].mxu0 %v98_v41  ;;  %205 = vmatmul.mubr.bf16.vlgmr.msra.gmra.mrb[0].mxu1 %v98_v41 }
 0x1e2   :  { %v165_v42 = vpop.f32.mrb[0].mxu0  ;;  %v206_v43 = vpop.f32.mrb[0].mxu1 }
 0x1e3   :  { %213 = vst [vmem:[#allocation8] sm:$0xff] %v165_v42  ;;  %215 = vst [vmem:[#allocation8 + $0x10] sm:$0xff] %v206_v43  ;;  %v167_v44 = vpop.f32.mrb[1].mxu0  ;;  %v208_v45 = vpop.f32.mrb[1].mxu1 }
 0x1e4   :  { %214 = vst [vmem:[#allocation8 + $0x8] sm:$0xff] %v167_v44  ;;  %216 = vst [vmem:[#allocation8 + $0x18] sm:$0xff] %v208_v45  ;;  %v169_v46 = vpop.f32.mrb[2].mxu0  ;;  %v210_v47 = vpop.f32.mrb[2].mxu1 }
 0x1e5   :  { %v170_v48 = vpop.f32.mrb[3].mxu0  ;;  %v211_v49 = vpop.f32.mrb[3].mxu1 }
 0x1e6   :  { %348 = shalt.err (!%p345_p3)
}
 0x1e7   :  { %s349_s10 = scalar_lea.hbm %s471_s3, 512 }
 0x1e8   :  { %p350_p4 = scmp.ne.s32.totalorder %s471_s3, %s349_s10  ;;  %p353_p5 = scmp.lt.u32.totalorder %s349_s10, %s471_s3 }
 0x1ea   :  { %p355_p6 = pnand %p353_p5, %p350_p4 }
 0x1ec   :  { %358 = shalt.err (!%p355_p6)
}
 0x1ed   :  { %226 = dma.vmem_to_hbm [thread:$0]  %s224_s6, 512, %s471_s3, [#allocation9]  }
 0x1ee   :  { %367 = dma.done.wait [#allocation9], 512  }
 0x1ef   :  { %368 = vsyncadd [#allocation9], 4294966784 }
 0x1f0   :  { %230 = vsyncpa [#allocation9], 1 }
 0x1f1   :  { %231 = vsyncmov [#allocation4] }
 0x1f4   :  { %s232_s17 = vpop.sfrf %231 }
 0x1f5   :  { %p259_p7 = scmp.ne.s32.totalorder %s232_s17, 0 }
 0x1f7   :  { %236 = shalt.err (%p259_p7)  }
 0x1f8   :  { %238 = vsyncmov [#allocation4 + $0x1] }
 0x1fb   :  { %s239_s18 = vpop.sfrf %238 }
 0x1fc   :  { %p260_p8 = scmp.ne.s32.totalorder %s239_s18, 0 }
 0x1fe   :  { %243 = shalt.err (%p260_p8)  }
 0x1ff   :  { %244 = vsyncmov [#allocation5] }
 0x202   :  { %s245_s2 = vpop.sfrf %244 }
 0x203   :  { %p261_p9 = scmp.ne.s32.totalorder %s245_s2, 0 }
 0x205   :  { %249 = shalt.err (%p261_p9)  }

</bundles_post_ra>
